<compile_context>
chip_gen: v7x
topology: tpu7x:2x2x1
jax: 0.10.0
libtpu: 0.0.40
codegen_flags: <defaults>
</compile_context>

<pallas_src>
import jax
import jax.numpy as jnp
from jax.experimental import pallas as pl
from jax.experimental.pallas import tpu as pltpu


def _round_up(a, m):
    return ((a + m - 1) // m) * m


def _valuenet_kernel(x_ref, w1_ref, b1_ref, w2_ref, b2_ref, w3_ref, b3_ref, o_ref):
    # x_ref: (F, TILE_B) f32; weights in (out, in) layout; biases as (H, 1) columns.
    x = x_ref[...].astype(jnp.bfloat16)                                    # (F, TB)

    # Layer 1: (H, F) @ (F, TB) -> (H, TB), bf16 MXU operands, f32 accumulate.
    h1 = jnp.dot(w1_ref[...], x, preferred_element_type=jnp.float32)
    h1 = jnp.maximum(h1 + b1_ref[...], 0.0)                                # ReLU

    # Layer 2: (H, H) @ (H, TB) -> (H, TB).
    h2 = jnp.dot(w2_ref[...], h1.astype(jnp.bfloat16),
                 preferred_element_type=jnp.float32)
    h2 = jnp.maximum(h2 + b2_ref[...], 0.0)                                # ReLU

    # Layer 3 (out_features = 1): VPU multiply + sublane reduction; the result is a
    # lane-dense (1, TB) row, so the store is a full-width vst.
    y = jnp.sum(h2 * w3_ref[...], axis=0, keepdims=True) + b3_ref[0, 0]
    o_ref[...] = y.astype(o_ref.dtype)


def value_net_forward(x, params, *, tile_b=512):
    """Forward pass of ValueNet. x: (B, F) float32. Returns (B, 1) float32."""
    w1, b1, w2, b2, w3, b3 = params
    B, F = x.shape
    H = w1.shape[0]

    # Batch tile on the lane axis: a multiple of 128, clamped for tiny batches.
    tile_b = max(128, _round_up(tile_b, 128))
    tile_b = min(tile_b, _round_up(B, 128))
    b_pad = _round_up(B, tile_b)

    # Wrapper-side layout plumbing: pad the batch and transpose to (F, B_pad).
    x_t = jnp.pad(x, ((0, b_pad - B), (0, 0))).T                           # (F, B_pad)

    grid = (b_pad // tile_b,)

    out = pl.pallas_call(
        _valuenet_kernel,
        out_shape=jax.ShapeDtypeStruct((1, b_pad), jnp.float32),
        grid=grid,
        in_specs=[
            pl.BlockSpec((F, tile_b), lambda i: (0, i)),        # x tile (pipelined)
            pl.BlockSpec((H, F), lambda i: (0, 0)),             # w1 (resident)
            pl.BlockSpec((H, 1), lambda i: (0, 0)),             # b1
            pl.BlockSpec((H, H), lambda i: (0, 0)),             # w2 (resident)
            pl.BlockSpec((H, 1), lambda i: (0, 0)),             # b2
            pl.BlockSpec((H, 1), lambda i: (0, 0)),             # w3 column
            pl.BlockSpec(memory_space=pltpu.MemorySpace.SMEM),  # b3 scalar
        ],
        out_specs=pl.BlockSpec((1, tile_b), lambda i: (0, i)),
        compiler_params=pltpu.CompilerParams(
            dimension_semantics=("parallel",),
        ),
    )(x_t, w1, b1, w2, b2, w3, b3)

    return out[0, :B].reshape(B, 1)


def init_params(key, in_features, hidden_size=128):
    """PyTorch-style uniform fan-in init; weights in (out, in) layout.

    w1/w2 are stored in bfloat16 (MXU-native); biases and w3 (VPU path) stay f32.
    """
    ks = jax.random.split(key, 6)

    def lin(kw, kb, fan_in, fan_out):
        bound = 1.0 / jnp.sqrt(jnp.float32(fan_in))
        w = jax.random.uniform(kw, (fan_out, fan_in), jnp.float32, -bound, bound)
        b = jax.random.uniform(kb, (fan_out, 1), jnp.float32, -bound, bound)
        return w, b

    w1, b1 = lin(ks[0], ks[1], in_features, hidden_size)
    w2, b2 = lin(ks[2], ks[3], hidden_size, hidden_size)
    w3, b3 = lin(ks[4], ks[5], hidden_size, 1)

    return (
        w1.astype(jnp.bfloat16), b1,
        w2.astype(jnp.bfloat16), b2,
        w3.T,                      # (H, 1) column for the VPU reduce
        b3,                        # (1, 1) scalar, read from SMEM
    )


def _reference_forward(x, params):
    """Pure-JAX f32 reference (using the same bf16-rounded weight values)."""
    w1, b1, w2, b2, w3, b3 = params
    w1f = w1.astype(jnp.float32)
    w2f = w2.astype(jnp.float32)
    h1 = jnp.maximum(x @ w1f.T + b1[:, 0], 0.0)
    h2 = jnp.maximum(h1 @ w2f.T + b2[:, 0], 0.0)
    return h2 @ w3 + b3[0]


if __name__ == "__main__":
    key = jax.random.PRNGKey(0)
    k_x, k_p = jax.random.split(key)

    batch = 8
    in_features = 8      # LunarLanderContinuous observation dim
    hidden_size = 128

    x = jax.random.normal(k_x, (batch, in_features), dtype=jnp.float32)
    params = init_params(k_p, in_features, hidden_size)

    out = value_net_forward(x, params)
    out = jax.block_until_ready(out)

    ref = _reference_forward(x, params)
    assert out.shape == (batch, 1)
    # bf16 MXU operands with f32 accumulation -> looser tolerance vs f32 reference.
    assert jnp.allclose(out, ref, atol=2e-2, rtol=2e-2), (out, ref)

    print("KERNEL_OK")
</pallas_src>

<mosaic_0001>
module attributes {stable_mosaic.version = 11 : i64} {
  func.func @_valuenet_kernel(%arg0: i32, %arg1: memref<8x128xf32, #tpu.memory_space<vmem>>, %arg2: memref<128x8xbf16, #tpu.memory_space<vmem>>, %arg3: memref<128x1xf32, #tpu.memory_space<vmem>>, %arg4: memref<128x128xbf16, #tpu.memory_space<vmem>>, %arg5: memref<128x1xf32, #tpu.memory_space<vmem>>, %arg6: memref<128x1xf32, #tpu.memory_space<vmem>>, %arg7: memref<1x1xf32, #tpu.memory_space<smem>>, %arg8: memref<1x128xf32, #tpu.memory_space<vmem>>) attributes {dimension_semantics = [#tpu.dimension_semantics<parallel>], iteration_bounds = array<i64: 1>, scalar_prefetch = 0 : i64, scratch_operands = 0 : i64, tpu.core_type = #tpu.core_type<tc>, window_params = [{transform_indices = @transform_0, window_bounds = array<i64: 8, 128>}, {pipeline_mode = #tpu.pipeline_mode<synchronous>, transform_indices = @transform_1, window_bounds = array<i64: 128, 8>}, {pipeline_mode = #tpu.pipeline_mode<synchronous>, transform_indices = @transform_2, window_bounds = array<i64: 128, 1>}, {pipeline_mode = #tpu.pipeline_mode<synchronous>, transform_indices = @transform_3, window_bounds = array<i64: 128, 128>}, {pipeline_mode = #tpu.pipeline_mode<synchronous>, transform_indices = @transform_4, window_bounds = array<i64: 128, 1>}, {pipeline_mode = #tpu.pipeline_mode<synchronous>, transform_indices = @transform_5, window_bounds = array<i64: 128, 1>}, {transform_indices = @transform_6, window_bounds = array<i64: 1, 1>}, {transform_indices = @transform_7, window_bounds = array<i64: 1, 128>}]} {
    %c0 = arith.constant 0 : index
    %c0_0 = arith.constant 0 : index
    %0 = vector.load %arg1[%c0, %c0_0] : memref<8x128xf32, #tpu.memory_space<vmem>>, vector<8x128xf32>
    %1 = arith.truncf %0 : vector<8x128xf32> to vector<8x128xbf16>
    %c0_1 = arith.constant 0 : index
    %c0_2 = arith.constant 0 : index
    %2 = vector.load %arg2[%c0_1, %c0_2] : memref<128x8xbf16, #tpu.memory_space<vmem>>, vector<128x8xbf16>
    %cst = arith.constant dense<0.000000e+00> : vector<128x128xf32>
    %3 = tpu.matmul %2, %1, %cst {dimension_numbers = #tpu.dot_dimension_numbers<[1], [0], [0], [1], [0, 0, 1, 1], [], []>} : vector<128x8xbf16>, vector<8x128xbf16>, vector<128x128xf32> -> vector<128x128xf32>
    %c0_3 = arith.constant 0 : index
    %c0_4 = arith.constant 0 : index
    %4 = vector.load %arg3[%c0_3, %c0_4] : memref<128x1xf32, #tpu.memory_space<vmem>>, vector<128x1xf32>
    %5 = vector.broadcast %4 : vector<128x1xf32> to vector<128x128xf32>
    %6 = arith.addf %3, %5 : vector<128x128xf32>
    %cst_5 = arith.constant 0.000000e+00 : f32
    %7 = vector.broadcast %cst_5 : f32 to vector<128x128xf32>
    %8 = arith.maximumf %6, %7 : vector<128x128xf32>
    %c0_6 = arith.constant 0 : index
    %c0_7 = arith.constant 0 : index
    %9 = vector.load %arg4[%c0_6, %c0_7] : memref<128x128xbf16, #tpu.memory_space<vmem>>, vector<128x128xbf16>
    %10 = arith.truncf %8 : vector<128x128xf32> to vector<128x128xbf16>
    %cst_8 = arith.constant dense<0.000000e+00> : vector<128x128xf32>
    %11 = tpu.matmul %9, %10, %cst_8 {dimension_numbers = #tpu.dot_dimension_numbers<[1], [0], [0], [1], [0, 0, 1, 1], [], []>} : vector<128x128xbf16>, vector<128x128xbf16>, vector<128x128xf32> -> vector<128x128xf32>
    %c0_9 = arith.constant 0 : index
    %c0_10 = arith.constant 0 : index
    %12 = vector.load %arg5[%c0_9, %c0_10] : memref<128x1xf32, #tpu.memory_space<vmem>>, vector<128x1xf32>
    %13 = vector.broadcast %12 : vector<128x1xf32> to vector<128x128xf32>
    %14 = arith.addf %11, %13 : vector<128x128xf32>
    %cst_11 = arith.constant 0.000000e+00 : f32
    %15 = vector.broadcast %cst_11 : f32 to vector<128x128xf32>
    %16 = arith.maximumf %14, %15 : vector<128x128xf32>
    %c0_12 = arith.constant 0 : index
    %c0_13 = arith.constant 0 : index
    %17 = vector.load %arg6[%c0_12, %c0_13] : memref<128x1xf32, #tpu.memory_space<vmem>>, vector<128x1xf32>
    %18 = vector.broadcast %17 : vector<128x1xf32> to vector<128x128xf32>
    %19 = arith.mulf %16, %18 : vector<128x128xf32>
    %cst_14 = arith.constant dense<0.000000e+00> : vector<128xf32>
    %20 = vector.multi_reduction <add>, %19, %cst_14 [0] : vector<128x128xf32> to vector<128xf32>
    %21 = vector.shape_cast %20 : vector<128xf32> to vector<1x128xf32>
    %c0_15 = arith.constant 0 : index
    %c0_16 = arith.constant 0 : index
    %22 = memref.load %arg7[%c0_15, %c0_16] : memref<1x1xf32, #tpu.memory_space<smem>>
    %23 = vector.broadcast %22 : f32 to vector<1x128xf32>
    %24 = arith.addf %21, %23 : vector<1x128xf32>
    %c0_17 = arith.constant 0 : index
    %c0_18 = arith.constant 0 : index
    %25 = vector.load %arg8[%c0_17, %c0_18] : memref<1x128xf32, #tpu.memory_space<vmem>>, vector<1x128xf32>
    tpu.vector_store %arg8[%c0_17, %c0_18], %24 {strides = array<i32>} : memref<1x128xf32, #tpu.memory_space<vmem>>, vector<1x128xf32>,
    return
  }
  func.func @transform_0(%arg0: i32) -> (i32, i32) {
    %c0_i32 = arith.constant 0 : i32
    %c0_i32_0 = arith.constant 0 : i32
    return %c0_i32, %arg0 : i32, i32
  }
  func.func @transform_1(%arg0: i32) -> (i32, i32) {
    %c0_i32 = arith.constant 0 : i32
    %c0_i32_0 = arith.constant 0 : i32
    %c0_i32_1 = arith.constant 0 : i32
    return %c0_i32, %c0_i32_0 : i32, i32
  }
  func.func @transform_2(%arg0: i32) -> (i32, i32) {
    %c0_i32 = arith.constant 0 : i32
    %c0_i32_0 = arith.constant 0 : i32
    %c0_i32_1 = arith.constant 0 : i32
    return %c0_i32, %c0_i32_0 : i32, i32
  }
  func.func @transform_3(%arg0: i32) -> (i32, i32) {
    %c0_i32 = arith.constant 0 : i32
    %c0_i32_0 = arith.constant 0 : i32
    %c0_i32_1 = arith.constant 0 : i32
    return %c0_i32, %c0_i32_0 : i32, i32
  }
  func.func @transform_4(%arg0: i32) -> (i32, i32) {
    %c0_i32 = arith.constant 0 : i32
    %c0_i32_0 = arith.constant 0 : i32
    %c0_i32_1 = arith.constant 0 : i32
    return %c0_i32, %c0_i32_0 : i32, i32
  }
  func.func @transform_5(%arg0: i32) -> (i32, i32) {
    %c0_i32 = arith.constant 0 : i32
    %c0_i32_0 = arith.constant 0 : i32
    %c0_i32_1 = arith.constant 0 : i32
    return %c0_i32, %c0_i32_0 : i32, i32
  }
  func.func @transform_6(%arg0: i32) -> (i32, i32) {
    %c0_i32 = arith.constant 0 : i32
    %c0_i32_0 = arith.constant 0 : i32
    %c0_i32_1 = arith.constant 0 : i32
    return %c0_i32, %c0_i32_0 : i32, i32
  }
  func.func @transform_7(%arg0: i32) -> (i32, i32) {
    %c0_i32 = arith.constant 0 : i32
    %c0_i32_0 = arith.constant 0 : i32
    return %c0_i32, %arg0 : i32, i32
  }
}

</mosaic_0001>

<bundles_post_ra>
// kernel: tpu_custom_call.1
= control target key start
LH: loop header
LB: loop body
LE: loop exit
PB: predicated region body
PF: predicated region fallthrough
CT: control target
= control target key end

     0   :  { %vm208_vm0 = vcmask 1043456   ;;  %v917_v3 = vmov 0   ;;  %vm183_vm1 = vcmask 64512   ;;  %s1177_s0 = inlined_call_operand.vmem [shape: f32[8,128], index: 0, kind: input, shape index: {}]   ;;  %s1178_s1 = inlined_call_operand.vmem [shape: bf16[128,8], index: 1, kind: input, shape index: {}]   ;;  %s1179_s2 = inlined_call_operand.vmem [shape: f32[128,1], index: 2, kind: input, shape index: {}]   ;;  %s1180_s3 = inlined_call_operand.vmem [shape: bf16[128,128], index: 3, kind: input, shape index: {}]   ;;  %s1181_s4 = inlined_call_operand.vmem [shape: f32[128,1], index: 4, kind: input, shape index: {}]   ;;  %s1182_s5 = inlined_call_operand.vmem [shape: f32[128,1], index: 5, kind: input, shape index: {}]   ;;  %s1183_s6 = inlined_call_operand.<no memory space> [shape: f32[1,1], index: 6, kind: input, shape index: {}]   ;;  %s1184_s7 = inlined_call_operand.hbm [shape: f32[1,128], index: 7, kind: output, shape index: {}]  }
   0x1   :  { %v49_v0 = vld [vmem:[%s1179_s2 + $0x10] sm:$0xff]  ;;  %v47_v1 = vld [vmem:[%s1179_s2] sm:$0xff]  ;;  %876 = vset.pattern.permute.xlu1 %v917_v3  ;;  %875 = vset.pattern.permute.xlu0 %v917_v3  ;;  %v50_v5 = vld [vmem:[%s1179_s2 + $0x18] sm:$0xff] }
   0x2   :  { %v29_v2 = vld [vmem:[%s1177_s0] sm:$0xff]  ;;  %75 = vperm.xlu1 %876, %v49_v0   ;;  %65 = vperm.xlu0 %875, %v47_v1   ;;  %v48_v8 = vld [vmem:[%s1179_s2 + $0x8] sm:$0xff]  ;;  %v879_v10 = vld [vmem:[%s1178_s1 + $0x10] sm:$0xff]  }
   0x3   :  { %v30_v4 = vpack.c.bf16 %v29_v2, %v29_v2  ;;  %v877_v6 = vld [vmem:[%s1178_s1] sm:$0xff]   ;;  %v878_v9 = vld [vmem:[%s1178_s1 + $0x8] sm:$0xff]   ;;  %v54_v13 = vld [vmem:[%s1179_s2 + $0x38] sm:$0xff] }
   0x4   :  { %808 = vmatprep.mubr.msk.bf16.mxu0 %vm183_vm1, %v877_v6  ;;  %v52_v11 = vld [vmem:[%s1179_s2 + $0x28] sm:$0xff]  ;;  %v51_v12 = vld [vmem:[%s1179_s2 + $0x20] sm:$0xff]  ;;  %v53_v14 = vld [vmem:[%s1179_s2 + $0x30] sm:$0xff] }
   0x5   :  { %872 = vmatprep.subr.msk.bf16.mxu0 %vm208_vm0, %v30_v4  ;;  %v210_v7 = vsel %vm208_vm0, %v30_v4, 0  ;;  %v880_v15 = vld [vmem:[%s1178_s1 + $0x18] sm:$0xff]   ;;  %v881_v16 = vld [vmem:[%s1178_s1 + $0x20] sm:$0xff]   ;;  %v56_v17 = vld [vmem:[%s1179_s2 + $0x48] sm:$0xff] }
   0x6   :  { %807 = vmatpush3.bf16.msra.mxu0 %v210_v7  ;;  %80 = vperm.xlu1 %876, %v50_v5   ;;  %v55_v18 = vld [vmem:[%s1179_s2 + $0x40] sm:$0xff]  ;;  %v58_v19 = vld [vmem:[%s1179_s2 + $0x58] sm:$0xff]  ;;  %v57_v20 = vld [vmem:[%s1179_s2 + $0x50] sm:$0xff] }
   0x7   :  { %70 = vperm.xlu0 %875, %v48_v8   ;;  %v882_v21 = vld [vmem:[%s1178_s1 + $0x28] sm:$0xff]   ;;  %v883_v22 = vld [vmem:[%s1178_s1 + $0x30] sm:$0xff]   ;;  %v59_v24 = vld [vmem:[%s1179_s2 + $0x60] sm:$0xff] }
   0x8   :  { %v60_v23 = vld [vmem:[%s1179_s2 + $0x68] sm:$0xff]  ;;  %v62_v25 = vld [vmem:[%s1179_s2 + $0x78] sm:$0xff]  ;;  %v61_v26 = vld [vmem:[%s1179_s2 + $0x70] sm:$0xff] }
   0x9   :  { %809 = vmatmul.mubr.msk.bf16.vlgmr.msra.gmra.mrb[0].mxu0 %vm183_vm1, %v878_v9  ;;  %v884_v27 = vld [vmem:[%s1178_s1 + $0x38] sm:$0xff]  }
   0xa   :  { %812 = vmatprep.mubr.msk.bf16.mxu0 %vm183_vm1, %v879_v10  ;;  %90 = vperm.xlu1 %876, %v52_v11  }
   0xb   :  { %85 = vperm.xlu0 %875, %v51_v12  }
   0xe   :  { %100 = vperm.xlu1 %876, %v54_v13  }
   0xf   :  { %95 = vperm.xlu0 %875, %v53_v14  }
  0x11   :  { %813 = vmatmul.mubr.msk.bf16.gmra.mrb[4].mxu0 %vm183_vm1, %v880_v15 }
  0x12   :  { %816 = vmatprep.mubr.msk.bf16.mxu0 %vm183_vm1, %v881_v16  ;;  %110 = vperm.xlu1 %876, %v56_v17  }
  0x13   :  { %105 = vperm.xlu0 %875, %v55_v18  }
  0x16   :  { %120 = vperm.xlu1 %876, %v58_v19  }
  0x17   :  { %115 = vperm.xlu0 %875, %v57_v20  }
  0x19   :  { %817 = vmatmul.mubr.msk.bf16.gmra.mrb[8].mxu0 %vm183_vm1, %v882_v21 }
  0x1a   :  { %820 = vmatprep.mubr.msk.bf16.mxu0 %vm183_vm1, %v883_v22  ;;  %130 = vperm.xlu1 %876, %v60_v23  }
  0x1b   :  { %125 = vperm.xlu0 %875, %v59_v24  }
  0x1c   :  { %13 = vsyncpa [#allocation4], 0  ;;  %v350_v28 = vld [vmem:[%s1181_s4 + $0x8] sm:$0xff]  ;;  %v349_v29 = vld [vmem:[%s1181_s4] sm:$0xff]  ;;  %s918_s27 = smov [#allocation3]  }
  0x1d   :  { %v352_v30 = vld [vmem:[%s1181_s4 + $0x18] sm:$0xff]  ;;  %v351_v31 = vld [vmem:[%s1181_s4 + $0x10] sm:$0xff]  ;;  %v607_v32 = vld [vmem:[%s1182_s5 + $0x8] sm:$0xff]  ;;  %s749_s28 = sshll.u32 %s918_s27, 4  ;;  %s750_s28 = int_to_ptr.vmem [resolvable:$true] %s749_s28 }
  0x1e   :  { %140 = vperm.xlu1 %876, %v62_v25   ;;  %v606_v33 = vld [vmem:[%s1182_s5] sm:$0xff]  ;;  %v608_v34 = vld [vmem:[%s1182_s5 + $0x10] sm:$0xff]  ;;  %v609_v36 = vld [vmem:[%s1182_s5 + $0x18] sm:$0xff]  ;;  %s893_s29 = scalar_lea.vmem %s750_s28, 16  ;;  %s897_s2 = scalar_lea.vmem %s750_s28, 32 }
  0x1f   :  { %135 = vperm.xlu0 %875, %v61_v26   ;;  %v353_v35 = vld [vmem:[%s1181_s4 + $0x20] sm:$0xff]  ;;  %v354_v37 = vld [vmem:[%s1181_s4 + $0x28] sm:$0xff]  ;;  %v355_v39 = vld [vmem:[%s1181_s4 + $0x30] sm:$0xff]  ;;  %p894_p0 = scmp.ne.s32.totalorder %s750_s28, %s893_s29  ;;  %p898_p1 = scmp.lt.s32.totalorder %s750_s28, %s750_s28 }
  0x20   :  { %v610_v38 = vld [vmem:[%s1182_s5 + $0x20] sm:$0xff]  ;;  %v611_v40 = vld [vmem:[%s1182_s5 + $0x28] sm:$0xff]  ;;  %v356_v41 = vld [vmem:[%s1181_s4 + $0x38] sm:$0xff]  ;;  %p899_p2 = scmp.lt.s32.totalorder %s897_s2, %s893_s29 }
  0x21   :  { %821 = vmatmul.mubr.msk.bf16.gmra.mrb[12].mxu0 %vm183_vm1, %v884_v27  ;;  %v612_v42 = vld [vmem:[%s1182_s5 + $0x30] sm:$0xff]  ;;  %v357_v43 = vld [vmem:[%s1181_s4 + $0x40] sm:$0xff]  ;;  %v613_v44 = vld [vmem:[%s1182_s5 + $0x38] sm:$0xff] }
  0x22   :  { %372 = vperm.xlu1 %876, %v350_v28   ;;  %v358_v45 = vld [vmem:[%s1181_s4 + $0x48] sm:$0xff]  ;;  %v614_v46 = vld [vmem:[%s1182_s5 + $0x40] sm:$0xff]  ;;  %v359_v47 = vld [vmem:[%s1181_s4 + $0x50] sm:$0xff]  ;;  %p900_p3 = por %p899_p2, %p898_p1 }
  0x23   :  { %367 = vperm.xlu0 %875, %v349_v29   ;;  %v615_v48 = vld [vmem:[%s1182_s5 + $0x48] sm:$0xff]  ;;  %v360_v49 = vld [vmem:[%s1181_s4 + $0x58] sm:$0xff]  ;;  %v616_v50 = vld [vmem:[%s1182_s5 + $0x50] sm:$0xff] }
  0x24   :  { %v361_v51 = vld [vmem:[%s1181_s4 + $0x60] sm:$0xff]  ;;  %v617_v52 = vld [vmem:[%s1182_s5 + $0x58] sm:$0xff]  ;;  %v362_v53 = vld [vmem:[%s1181_s4 + $0x68] sm:$0xff]  ;;  %p901_p4 = pnand %p900_p3, %p894_p0 }
  0x25   :  { %v618_v54 = vld [vmem:[%s1182_s5 + $0x60] sm:$0xff]  ;;  %v363_v55 = vld [vmem:[%s1181_s4 + $0x70] sm:$0xff]  ;;  %v619_v56 = vld [vmem:[%s1182_s5 + $0x68] sm:$0xff] }
  0x26   :  { %382 = vperm.xlu1 %876, %v352_v30   ;;  %v364_v57 = vld [vmem:[%s1181_s4 + $0x78] sm:$0xff]  ;;  %v620_v59 = vld [vmem:[%s1182_s5 + $0x70] sm:$0xff]  ;;  %v885_v60 = vld [vmem:[%s1180_s3] sm:$0xff]  }
  0x27   :  { %377 = vperm.xlu0 %875, %v351_v31   ;;  %v621_v58 = vld [vmem:[%s1182_s5 + $0x78] sm:$0xff]  ;;  %v886_v61 = vld [vmem:[%s1180_s3 + $0x10] sm:$0xff]   ;;  %840 = vmatprep.mubr.bf16.mxu0 %v885_v60 }
  0x28   :  { %844 = vmatprep.mubr.bf16.mxu1 %v886_v61 }
  0x2a   :  { %629 = vperm.xlu1 %876, %v607_v32  }
  0x2b   :  { %624 = vperm.xlu0 %875, %v606_v33  }
  0x2e   :  { %634 = vperm.xlu1 %876, %v608_v34  }
  0x2f   :  { %387 = vperm.xlu0 %875, %v353_v35  }
  0x32   :  { %639 = vperm.xlu1 %876, %v609_v36  }
  0x33   :  { %392 = vperm.xlu0 %875, %v354_v37  }
  0x36   :  { %644 = vperm.xlu1 %876, %v610_v38  }
  0x37   :  { %397 = vperm.xlu0 %875, %v355_v39  }
  0x3a   :  { %649 = vperm.xlu1 %876, %v611_v40  }
  0x3b   :  { %402 = vperm.xlu0 %875, %v356_v41  }
  0x3e   :  { %654 = vperm.xlu1 %876, %v612_v42  }
  0x3f   :  { %407 = vperm.xlu0 %875, %v357_v43  }
  0x42   :  { %659 = vperm.xlu1 %876, %v613_v44  }
  0x43   :  { %412 = vperm.xlu0 %875, %v358_v45  }
  0x46   :  { %664 = vperm.xlu1 %876, %v614_v46  }
  0x47   :  { %417 = vperm.xlu0 %875, %v359_v47  }
  0x4a   :  { %669 = vperm.xlu1 %876, %v615_v48  }
  0x4b   :  { %422 = vperm.xlu0 %875, %v360_v49  }
  0x4e   :  { %674 = vperm.xlu1 %876, %v616_v50  }
  0x4f   :  { %427 = vperm.xlu0 %875, %v361_v51  }
  0x52   :  { %679 = vperm.xlu1 %876, %v617_v52  }
  0x53   :  { %432 = vperm.xlu0 %875, %v362_v53  }
  0x56   :  { %684 = vperm.xlu1 %876, %v618_v54  }
  0x57   :  { %437 = vperm.xlu0 %875, %v363_v55  }
  0x5a   :  { %689 = vperm.xlu1 %876, %v619_v56  }
  0x5b   :  { %442 = vperm.xlu0 %875, %v364_v57  }
  0x5e   :  { %699 = vperm.xlu1 %876, %v621_v58  }
  0x5f   :  { %694 = vperm.xlu0 %875, %v620_v59  }
  0x81   :  { %v66_v62 = vpop.permute.xlu0 %65  ;;  %v76_v63 = vpop.permute.xlu1 %75 }
  0x85   :  { %v81_v1 = vpop.permute.xlu1 %80 }
  0x86   :  { %v71_v0 = vpop.permute.xlu0 %70 }
  0x89   :  { %v91_v3 = vpop.permute.xlu1 %90 }
  0x8a   :  { %v86_v2 = vpop.permute.xlu0 %85 }
  0x8d   :  { %v101_v8 = vpop.permute.xlu1 %100 }
  0x8e   :  { %v96_v4 = vpop.permute.xlu0 %95 }
  0x91   :  { %v111_v20 = vpop.permute.xlu1 %110 }
  0x92   :  { %v106_v16 = vpop.permute.xlu0 %105 }
  0x95   :  { %v121_v33 = vpop.permute.xlu1 %120 }
  0x96   :  { %v116_v29 = vpop.permute.xlu0 %115 }
  0x99   :  { %v131_v46 = vpop.permute.xlu1 %130 }
  0x9a   :  { %v126_v41 = vpop.permute.xlu0 %125 }
  0x9d   :  { %v141_v58 = vpop.permute.xlu1 %140 }
  0x9e   :  { %v136_v53 = vpop.permute.xlu0 %135 }
  0xdc   :  { %v810_v5 = vpop.f32.mrb[0].mxu0 }
  0xdd   :  { %v255_v6 = vadd.f32 %v810_v5, %v76_v63  ;;  %v246_v7 = vpop.f32.mrb[1].mxu0 }
  0xde   :  { %v811_v9 = vpop.f32.mrb[2].mxu0  ;;  %v247_v10 = vadd.f32 %v246_v7, %v66_v62  ;;  %v888_v7 = vld [vmem:[%s1180_s3 + $0x18] sm:$0xff]  }
  0xdf   :  { %v258_v11 = vadd.f32 %v811_v9, %v81_v1  ;;  %v249_v12 = vpop.f32.mrb[3].mxu0  ;;  %v311_v13 = vmax.f32 %v255_v6, 0.0  ;;  %v887_v6 = vld [vmem:[%s1180_s3 + $0x8] sm:$0xff]  }
  0xe0   :  { %v250_v15 = vadd.f32 %v249_v12, %v71_v0  ;;  %v309_v17 = vmax.f32 %v247_v10, 0.0  ;;  %v890_v9 = vld [vmem:[%s1180_s3 + $0x28] sm:$0xff]   ;;  %v891_v10 = vld [vmem:[%s1180_s3 + $0x30] sm:$0xff]   ;;  %v368_v12 = vpop.permute.xlu0 %367 }
  0xe1   :  { %v312_v14 = vmax.f32 %v258_v11, 0.0  ;;  %v892_v11 = vld [vmem:[%s1180_s3 + $0x38] sm:$0xff]  }
  0xe2   :  { %v310_v19 = vmax.f32 %v250_v15, 0.0 }
  0xe3   :  { %v342_v18 = vpack.c.bf16 %v312_v14, %v311_v13  ;;  %v373_v13 = vpop.permute.xlu1 %372 }
  0xe4   :  { %v814_v21 = vpop.f32.mrb[4].mxu0  ;;  %v341_v22 = vpack.c.bf16 %v310_v19, %v309_v17  ;;  %v378_v14 = vpop.permute.xlu0 %377 }
  0xe5   :  { %v271_v23 = vadd.f32 %v814_v21, %v96_v4  ;;  %v262_v24 = vpop.f32.mrb[5].mxu0 }
  0xe6   :  { %v263_v25 = vadd.f32 %v262_v24, %v86_v2  ;;  %v815_v26 = vpop.f32.mrb[6].mxu0  ;;  %824 = vmatprep.subr.bf16.mxu0 %v341_v22  ;;  %856 = vmatprep.subr.bf16.mxu1 %v341_v22 }
  0xe7   :  { %v274_v27 = vadd.f32 %v815_v26, %v101_v8  ;;  %v265_v28 = vpop.f32.mrb[7].mxu0  ;;  %825 = vmatpush3.bf16.msra.mxu0 %v341_v22  ;;  %864 = vmatpush3.bf16.msra.mxu1 %v341_v22  ;;  %v315_v31 = vmax.f32 %v271_v23, 0.0  ;;  %v889_v8 = vld [vmem:[%s1180_s3 + $0x20] sm:$0xff]   ;;  %v383_v15 = vpop.permute.xlu1 %382 }
  0xe8   :  { %v266_v30 = vadd.f32 %v265_v28, %v91_v3  ;;  %826 = vmatprep.subr.bf16.mxu0 %v342_v18  ;;  %857 = vmatprep.subr.bf16.mxu1 %v342_v18  ;;  %v313_v34 = vmax.f32 %v263_v25, 0.0 }
  0xe9   :  { %v316_v32 = vmax.f32 %v274_v27, 0.0 }
  0xea   :  { %v314_v35 = vmax.f32 %v266_v30, 0.0 }
  0xeb   :  { %v344_v36 = vpack.c.bf16 %v316_v32, %v315_v31  ;;  %827 = vmatpush3.bf16.msra.mxu0 %v342_v18  ;;  %865 = vmatpush3.bf16.msra.mxu1 %v342_v18  ;;  %v630_v17 = vpop.permute.xlu1 %629 }
  0xec   :  { %v343_v37 = vpack.c.bf16 %v314_v35, %v313_v34  ;;  %v818_v38 = vpop.f32.mrb[8].mxu0 }
  0xed   :  { %v287_v39 = vadd.f32 %v818_v38, %v116_v29  ;;  %v278_v40 = vpop.f32.mrb[9].mxu0 }
  0xee   :  { %v279_v42 = vadd.f32 %v278_v40, %v106_v16  ;;  %v819_v43 = vpop.f32.mrb[10].mxu0  ;;  %828 = vmatprep.subr.bf16.mxu0 %v343_v37  ;;  %858 = vmatprep.subr.bf16.mxu1 %v343_v37  ;;  %v625_v16 = vpop.permute.xlu0 %624 }
  0xef   :  { %v290_v44 = vadd.f32 %v819_v43, %v121_v33  ;;  %v281_v45 = vpop.f32.mrb[11].mxu0  ;;  %829 = vmatpush3.bf16.msra.mxu0 %v343_v37  ;;  %866 = vmatpush3.bf16.msra.mxu1 %v343_v37  ;;  %v319_v48 = vmax.f32 %v287_v39, 0.0  ;;  %v635_v19 = vpop.permute.xlu1 %634 }
  0xf0   :  { %v282_v47 = vadd.f32 %v281_v45, %v111_v20  ;;  %830 = vmatprep.subr.bf16.mxu0 %v344_v36  ;;  %859 = vmatprep.subr.bf16.mxu1 %v344_v36  ;;  %v317_v50 = vmax.f32 %v279_v42, 0.0 }
  0xf1   :  { %v320_v49 = vmax.f32 %v290_v44, 0.0 }
  0xf2   :  { %v318_v51 = vmax.f32 %v282_v47, 0.0  ;;  %v388_v18 = vpop.permute.xlu0 %387 }
  0xf3   :  { %v346_v52 = vpack.c.bf16 %v320_v49, %v319_v48  ;;  %831 = vmatpush3.bf16.msra.mxu0 %v344_v36  ;;  %867 = vmatpush3.bf16.msra.mxu1 %v344_v36  ;;  %v640_v21 = vpop.permute.xlu1 %639 }
  0xf4   :  { %v345_v54 = vpack.c.bf16 %v318_v51, %v317_v50  ;;  %v822_v55 = vpop.f32.mrb[12].mxu0 }
  0xf5   :  { %v303_v56 = vadd.f32 %v822_v55, %v136_v53  ;;  %v294_v57 = vpop.f32.mrb[13].mxu0 }
  0xf6   :  { %v295_v59 = vadd.f32 %v294_v57, %v126_v41  ;;  %v823_v60 = vpop.f32.mrb[14].mxu0  ;;  %832 = vmatprep.subr.bf16.mxu0 %v345_v54  ;;  %860 = vmatprep.subr.bf16.mxu1 %v345_v54  ;;  %v393_v20 = vpop.permute.xlu0 %392 }
  0xf7   :  { %v306_v61 = vadd.f32 %v823_v60, %v141_v58  ;;  %v297_v62 = vpop.f32.mrb[15].mxu0  ;;  %833 = vmatpush3.bf16.msra.mxu0 %v345_v54  ;;  %868 = vmatpush3.bf16.msra.mxu1 %v345_v54  ;;  %v323_v0 = vmax.f32 %v303_v56, 0.0  ;;  %v645_v23 = vpop.permute.xlu1 %644 }
  0xf8   :  { %v298_v63 = vadd.f32 %v297_v62, %v131_v46  ;;  %834 = vmatprep.subr.bf16.mxu0 %v346_v52  ;;  %861 = vmatprep.subr.bf16.mxu1 %v346_v52  ;;  %v321_v2 = vmax.f32 %v295_v59, 0.0 }
  0xf9   :  { %v324_v1 = vmax.f32 %v306_v61, 0.0 }
  0xfa   :  { %v322_v3 = vmax.f32 %v298_v63, 0.0  ;;  %v398_v22 = vpop.permute.xlu0 %397 }
  0xfb   :  { %v348_v4 = vpack.c.bf16 %v324_v1, %v323_v0  ;;  %835 = vmatpush3.bf16.msra.mxu0 %v346_v52  ;;  %869 = vmatpush3.bf16.msra.mxu1 %v346_v52  ;;  %v650_v25 = vpop.permute.xlu1 %649 }
  0xfc   :  { %v347_v5 = vpack.c.bf16 %v322_v3, %v321_v2 }
  0xfe   :  { %836 = vmatprep.subr.bf16.mxu0 %v347_v5  ;;  %862 = vmatprep.subr.bf16.mxu1 %v347_v5  ;;  %v403_v24 = vpop.permute.xlu0 %402 }
  0xff   :  { %837 = vmatpush3.bf16.msra.mxu0 %v347_v5  ;;  %870 = vmatpush3.bf16.msra.mxu1 %v347_v5  ;;  %v655_v27 = vpop.permute.xlu1 %654 }
 0x100   :  { %838 = vmatprep.subr.bf16.mxu0 %v348_v4  ;;  %863 = vmatprep.subr.bf16.mxu1 %v348_v4 }
 0x102   :  { %v408_v26 = vpop.permute.xlu0 %407 }
 0x103   :  { %839 = vmatpush3.bf16.msra.mxu0 %v348_v4  ;;  %871 = vmatpush3.bf16.msra.mxu1 %v348_v4  ;;  %v660_v29 = vpop.permute.xlu1 %659 }
 0x106   :  { %841 = vmatmul.mubr.bf16.vlgmr.msra.gmra.mrb[16].mxu0 %v887_v6  ;;  %845 = vmatmul.mubr.bf16.vlgmr.msra.gmra.mrb[0].mxu1 %v888_v7  ;;  %v413_v28 = vpop.permute.xlu0 %412 }
 0x107   :  { %848 = vmatprep.mubr.bf16.mxu1 %v889_v8  ;;  %v665_v31 = vpop.permute.xlu1 %664 }
 0x10a   :  { %v418_v30 = vpop.permute.xlu0 %417 }
 0x10b   :  { %v670_v46 = vpop.permute.xlu1 %669 }
 0x10e   :  { %849 = vmatmul.mubr.bf16.gmra.mrb[4].mxu1 %v890_v9  ;;  %v423_v32 = vpop.permute.xlu0 %422 }
 0x10f   :  { %852 = vmatprep.mubr.bf16.mxu1 %v891_v10  ;;  %v675_v62 = vpop.permute.xlu1 %674 }
 0x112   :  { %v428_v55 = vpop.permute.xlu0 %427 }
 0x116   :  { %853 = vmatmul.mubr.bf16.gmra.mrb[8].mxu1 %v892_v11  ;;  %v433_v8 = vpop.permute.xlu0 %432 }
 0x1d9   :  { %v842_v33 = vpop.f32.mrb[16].mxu0  ;;  %v846_v34 = vpop.f32.mrb[0].mxu1 }
 0x1da   :  { %v527_v35 = vpop.f32.mrb[17].mxu0  ;;  %v543_v36 = vpop.f32.mrb[1].mxu1  ;;  %v536_v37 = vadd.f32 %v842_v33, %v378_v14  ;;  %v552_v58 = vadd.f32 %v846_v34, %v398_v22 }
 0x1db   :  { %v528_v38 = vadd.f32 %v527_v35, %v368_v12  ;;  %v843_v39 = vpop.f32.mrb[18].mxu0  ;;  %v847_v40 = vpop.f32.mrb[2].mxu1  ;;  %v544_v48 = vadd.f32 %v543_v36, %v388_v18 }
 0x1dc   :  { %v530_v41 = vpop.f32.mrb[19].mxu0  ;;  %v546_v42 = vpop.f32.mrb[3].mxu1  ;;  %v539_v44 = vadd.f32 %v843_v39, %v383_v15  ;;  %v592_v47 = vmax.f32 %v536_v37, 0.0  ;;  %v555_v1 = vadd.f32 %v847_v40, %v403_v24  ;;  %v596_v4 = vmax.f32 %v552_v58, 0.0 }
 0x1dd   :  { %v590_v43 = vmax.f32 %v528_v38, 0.0  ;;  %v531_v45 = vadd.f32 %v530_v41, %v373_v13  ;;  %v547_v53 = vadd.f32 %v546_v42, %v393_v20  ;;  %v594_v59 = vmax.f32 %v544_v48, 0.0  ;;  %v680_v14 = vpop.permute.xlu1 %679  ;;  %v438_v34 = vpop.permute.xlu0 %437 }
 0x1de   :  { %v593_v51 = vmax.f32 %v539_v44, 0.0  ;;  %v704_v57 = vmul.f32 %v635_v19, %v592_v47  ;;  %v597_v9 = vmax.f32 %v555_v1, 0.0 }
 0x1df   :  { %v591_v49 = vmax.f32 %v531_v45, 0.0  ;;  %v702_v50 = vmul.f32 %v625_v16, %v590_v43  ;;  %v595_v3 = vmax.f32 %v547_v53, 0.0  ;;  %v706_v5 = vmul.f32 %v645_v23, %v594_v59 }
 0x1e0   :  { %v705_v0 = vmul.f32 %v640_v21, %v593_v51  ;;  %v708_v16 = vmul.f32 %v655_v27, %v596_v4  ;;  %v709_v22 = vmul.f32 %v660_v29, %v597_v9 }
 0x1e1   :  { %v703_v52 = vmul.f32 %v630_v17, %v591_v49  ;;  %v850_v54 = vpop.f32.mrb[4].mxu1  ;;  %v707_v10 = vmul.f32 %v650_v25, %v595_v3  ;;  %v685_v37 = vpop.permute.xlu1 %684 }
 0x1e2   :  { %v559_v56 = vpop.f32.mrb[5].mxu1  ;;  %v568_v18 = vadd.f32 %v850_v54, %v418_v30  ;;  %v443_v43 = vpop.permute.xlu0 %442 }
 0x1e3   :  { %v718_v60 = vadd.f32 %v703_v52, %v702_v50  ;;  %v851_v61 = vpop.f32.mrb[6].mxu1  ;;  %v560_v7 = vadd.f32 %v559_v56, %v408_v26 }
 0x1e4   :  { %v562_v63 = vpop.f32.mrb[7].mxu1  ;;  %v571_v33 = vadd.f32 %v851_v61, %v423_v32  ;;  %v600_v26 = vmax.f32 %v568_v18, 0.0 }
 0x1e5   :  { %v719_v2 = vadd.f32 %v718_v60, %v704_v57  ;;  %v563_v12 = vadd.f32 %v562_v63, %v413_v28  ;;  %v598_v19 = vmax.f32 %v560_v7, 0.0  ;;  %v690_v47 = vpop.permute.xlu1 %689 }
 0x1e6   :  { %v601_v38 = vmax.f32 %v571_v33, 0.0  ;;  %v712_v27 = vmul.f32 %v675_v62, %v600_v26  ;;  %v695_v53 = vpop.permute.xlu0 %694 }
 0x1e7   :  { %v720_v6 = vadd.f32 %v719_v2, %v705_v0  ;;  %v599_v23 = vmax.f32 %v563_v12, 0.0  ;;  %v710_v35 = vmul.f32 %v665_v31, %v598_v19  ;;  %v740_v0 = vstv %s1183_s6 }
 0x1e8   :  { %v713_v44 = vmul.f32 %v680_v14, %v601_v38 }
 0x1e9   :  { %v721_v11 = vadd.f32 %v720_v6, %v706_v5  ;;  %v854_v13 = vpop.f32.mrb[8].mxu1  ;;  %v711_v39 = vmul.f32 %v670_v46, %v599_v23 }
 0x1ea   :  { %v575_v15 = vpop.f32.mrb[9].mxu1  ;;  %v584_v30 = vadd.f32 %v854_v13, %v438_v34 }
 0x1eb   :  { %v722_v17 = vadd.f32 %v721_v11, %v707_v10  ;;  %v855_v20 = vpop.f32.mrb[10].mxu1  ;;  %v576_v25 = vadd.f32 %v575_v15, %v428_v55  ;;  %v700_v55 = vpop.permute.xlu1 %699 }
 0x1ec   :  { %v578_v21 = vpop.f32.mrb[11].mxu1  ;;  %v587_v45 = vadd.f32 %v855_v20, %v443_v43  ;;  %v604_v48 = vmax.f32 %v584_v30, 0.0 }
 0x1ed   :  { %v723_v24 = vadd.f32 %v722_v17, %v708_v16  ;;  %v579_v40 = vadd.f32 %v578_v21, %v433_v8  ;;  %v602_v42 = vmax.f32 %v576_v25, 0.0 }
 0x1ee   :  { %v605_v51 = vmax.f32 %v587_v45, 0.0  ;;  %v716_v54 = vmul.f32 %v695_v53, %v604_v48 }
 0x1ef   :  { %v724_v36 = vadd.f32 %v723_v24, %v709_v22  ;;  %v603_v32 = vmax.f32 %v579_v40, 0.0  ;;  %v714_v49 = vmul.f32 %v685_v37, %v602_v42 }
 0x1f0   :  { %v717_v56 = vmul.f32 %v700_v55, %v605_v51 }
 0x1f1   :  { %v725_v28 = vadd.f32 %v724_v36, %v710_v35  ;;  %v715_v52 = vmul.f32 %v690_v47, %v603_v32 }
 0x1f3   :  { %v726_v41 = vadd.f32 %v725_v28, %v711_v39 }
 0x1f5   :  { %v727_v29 = vadd.f32 %v726_v41, %v712_v27 }
 0x1f7   :  { %v728_v31 = vadd.f32 %v727_v29, %v713_v44 }
 0x1f9   :  { %v729_v50 = vadd.f32 %v728_v31, %v714_v49 }
 0x1fb   :  { %v730_v46 = vadd.f32 %v729_v50, %v715_v52 }
 0x1fd   :  { %v731_v57 = vadd.f32 %v730_v46, %v716_v54 }
 0x1ff   :  { %v732_v58 = vadd.f32 %v731_v57, %v717_v56 }
 0x201   :  { %v733_v59 = vrot.slane %v732_v58, 4 }
 0x203   :  { %v734_v60 = vadd.f32 %v733_v59, %v732_v58 }
 0x205   :  { %v735_v61 = vrot.slane %v734_v60, 2 }
 0x207   :  { %v736_v62 = vadd.f32 %v735_v61, %v734_v60 }
 0x209   :  { %v737_v63 = vrot.slane %v736_v62, 1 }
 0x20b   :  { %v738_v1 = vadd.f32 %v737_v63, %v736_v62 }
 0x20d   :  { %v741_v2 = vadd.f32 %v740_v0, %v738_v1 }
 0x20f   :  { %742 = vst [vmem:[#allocation3] sm:$0x1] %v741_v2 }
 0x210   :  { %904 = shalt.err (!%p901_p4)
}
 0x211   :  { %s905_s8 = scalar_lea.hbm %s1184_s7, 16 }
 0x212   :  { %p906_p5 = scmp.ne.s32.totalorder %s1184_s7, %s905_s8  ;;  %p909_p6 = scmp.lt.u32.totalorder %s905_s8, %s1184_s7 }
 0x214   :  { %p911_p7 = pnand %p909_p6, %p906_p5 }
 0x216   :  { %914 = shalt.err (!%p911_p7)
}
 0x217   :  { %752 = dma.vmem_to_hbm [thread:$0]  %s750_s28, 16, %s1184_s7, [#allocation4]  }
 0x218   :  { %915 = dma.done.wait [#allocation4], 16  }
 0x219   :  { %916 = vsyncadd [#allocation4], 4294967280 }
 0x21a   :  { %756 = vsyncpa [#allocation4], 1 }

</bundles_post_ra>
